<compile_context>
chip_gen: v7x
topology: tpu7x:2x2x1
jax: 0.10.0
libtpu: 0.0.40
codegen_flags: <defaults>
</compile_context>

<pallas_src>
import functools

import jax
import jax.numpy as jnp
from jax.experimental import pallas as pl
from jax.experimental.pallas import tpu as pltpu


NEG_SLOPE = 0.01          # PyTorch nn.LeakyReLU default
OUT_LANES = 128           # lane-dense output slab width
OUT_DTYPE = jnp.bfloat16  # halved output writeback (kernel is HBM-write-bound)
MAX_TILE_B = 4096         # safe vs v7x 32 MiB scoped VMEM incl. f32 intermediates


def policy_ind_kernel(x_ref, w1_ref, b1_ref, w2_ref, b2_ref, out_ref, *, n_actions):
    # ---- in-kernel f32 -> bf16 cast (VPU, hidden under DMA/MXU) ----
    x = x_ref[...].astype(w1_ref.dtype)

    # ---- fused layer 1: x @ [w1a | w1c] + [b1a | b1c], LeakyReLU ----
    h = jnp.dot(x, w1_ref[...], preferred_element_type=jnp.float32) + b1_ref[...]
    h = jnp.where(h > 0, h, NEG_SLOPE * h)                               # (tb, 2H) f32

    # ---- fused layer 2: one lane-dense (tb, 128) result slab ----
    # rows [0:H] x lanes [0:n_actions] = actor logits ; rows [H:2H] x lane n_actions = value
    fused = jnp.dot(h.astype(w2_ref.dtype), w2_ref[...],
                    preferred_element_type=jnp.float32) + b2_ref[...]    # (tb, 128) f32

    lane = jax.lax.broadcasted_iota(jnp.int32, fused.shape, 1)
    is_logit = lane < n_actions

    # masked softmax over logit lanes only; exp on the masked tensor so padded/value
    # lanes give exp(-inf) = 0 directly (no +inf generated, one less select).
    masked = jnp.where(is_logit, fused, -jnp.inf)
    m = jnp.max(masked, axis=-1, keepdims=True)
    e = jnp.exp(masked - m)
    denom = jnp.sum(e, axis=-1, keepdims=True)
    prob = e * pl.reciprocal(denom, approx=True)

    # probs in logit lanes, raw value in lane n_actions, zeros elsewhere
    out_ref[...] = jnp.where(is_logit, prob, fused).astype(out_ref.dtype)


def pack_params(params, dtype=jnp.bfloat16):
    """Fuse actor+critic weights into lane-dense bf16 tensors."""
    hidden = params["w1a"].shape[1]
    n_actions = params["w2a"].shape[1]
    assert n_actions + 1 <= OUT_LANES

    w1 = jnp.concatenate([params["w1a"], params["w1c"]], axis=1).astype(dtype)   # (obs, 2H)
    b1 = jnp.concatenate([params["b1a"], params["b1c"]], axis=1).astype(jnp.float32)

    w2 = jnp.zeros((2 * hidden, OUT_LANES), dtype)
    w2 = w2.at[:hidden, :n_actions].set(params["w2a"].astype(dtype))
    w2 = w2.at[hidden:, n_actions:n_actions + 1].set(params["w2c"].astype(dtype))

    b2 = jnp.zeros((1, OUT_LANES), jnp.float32)
    b2 = b2.at[:, :n_actions].set(params["b2a"])
    b2 = b2.at[:, n_actions:n_actions + 1].set(params["b2c"])
    return w1, b1, w2, b2, n_actions


def _default_tile_b(B):
    if B <= 1024:
        # small batch: single grid step — per-step fixed overhead (~0.35 us) dominates.
        return B
    # large batch: at least 2 grid steps so v7x's two TensorCores both get work
    # ("parallel" axis shards across cores); cap against VMEM incl. f32 intermediates.
    tile = min(MAX_TILE_B, pl.cdiv(B, 2))
    tile = max(16, (tile // 16) * 16)   # multiple of 16: clean bf16 sublane packing
    return tile


def policy_ind_forward(x, params, *, tile_b=None):
    """Returns (action_prob [B, n_actions] f32, state_values [B, 1] f32)."""
    w1, b1, w2, b2, n_actions = pack_params(params)
    B, obs = x.shape
    h2 = w1.shape[1]                      # 2 * hidden

    if tile_b is None:
        tile_b = _default_tile_b(B)
    tile_b = min(tile_b, B)
    grid = (pl.cdiv(B, tile_b),)

    cost = pl.CostEstimate(
        flops=2 * B * (obs * h2 + h2 * OUT_LANES),
        transcendentals=B * OUT_LANES,
        bytes_accessed=(B * obs * 4                     # x read (f32)
                        + B * OUT_LANES * 2             # output slab write (bf16)
                        + (obs * h2 + h2 * OUT_LANES) * 2   # bf16 weights
                        + (h2 + OUT_LANES) * 4),        # f32 biases
    )

    out = pl.pallas_call(
        functools.partial(policy_ind_kernel, n_actions=n_actions),
        out_shape=jax.ShapeDtypeStruct((B, OUT_LANES), OUT_DTYPE),
        grid_spec=pltpu.PrefetchScalarGridSpec(
            num_scalar_prefetch=0,
            grid=grid,
            in_specs=[
                pl.BlockSpec((tile_b, obs), lambda i: (i, 0)),       # x: tiled over batch
                pl.BlockSpec((obs, h2), lambda i: (0, 0)),           # W1: VMEM-resident
                pl.BlockSpec((1, h2), lambda i: (0, 0)),             # b1
                pl.BlockSpec((h2, OUT_LANES), lambda i: (0, 0)),     # W2
                pl.BlockSpec((1, OUT_LANES), lambda i: (0, 0)),      # b2
            ],
            out_specs=pl.BlockSpec((tile_b, OUT_LANES), lambda i: (i, 0)),
        ),
        compiler_params=pltpu.CompilerParams(
            dimension_semantics=("parallel",),
            vmem_limit_bytes=64 * 1024 * 1024,
        ),
        cost_estimate=cost,
    )(x, w1, b1, w2, b2)                   # x stays f32; cast happens in-kernel

    prob = out[:, :n_actions].astype(jnp.float32)
    val = out[:, n_actions:n_actions + 1].astype(jnp.float32)
    return prob, val


def init_params(key, obs_dim, n_actions, hidden=128):
    ks = jax.random.split(key, 8)
    scale_in = 1.0 / jnp.sqrt(obs_dim)
    scale_h = 1.0 / jnp.sqrt(hidden)
    return {
        # actor
        "w1a": jax.random.uniform(ks[0], (obs_dim, hidden), jnp.float32, -scale_in, scale_in),
        "b1a": jax.random.uniform(ks[1], (1, hidden), jnp.float32, -scale_in, scale_in),
        "w2a": jax.random.uniform(ks[2], (hidden, n_actions), jnp.float32, -scale_h, scale_h),
        "b2a": jax.random.uniform(ks[3], (1, n_actions), jnp.float32, -scale_h, scale_h),
        # critic
        "w1c": jax.random.uniform(ks[4], (obs_dim, hidden), jnp.float32, -scale_in, scale_in),
        "b1c": jax.random.uniform(ks[5], (1, hidden), jnp.float32, -scale_in, scale_in),
        "w2c": jax.random.uniform(ks[6], (hidden, 1), jnp.float32, -scale_h, scale_h),
        "b2c": jax.random.uniform(ks[7], (1, 1), jnp.float32, -scale_h, scale_h),
    }


def _reference(x, p):
    # Pure-JAX reference with the same bf16 rounding of x / weights the kernel sees
    # (hidden activation kept in f32, as in the PyTorch module).
    bf = lambda a: a.astype(jnp.bfloat16).astype(jnp.float32)
    leaky = lambda v: jnp.where(v > 0, v, NEG_SLOPE * v)
    xb = bf(x)
    logits = leaky(xb @ bf(p["w1a"]) + p["b1a"]) @ bf(p["w2a"]) + p["b2a"]
    prob = jax.nn.softmax(logits, axis=-1)
    val = leaky(xb @ bf(p["w1c"]) + p["b1c"]) @ bf(p["w2c"]) + p["b2c"]
    return prob, val


if __name__ == "__main__":
    key = jax.random.PRNGKey(0)
    k_x, k_p, k_x2 = jax.random.split(key, 3)

    obs_dim, n_actions = 32, 6
    params = init_params(k_p, obs_dim, n_actions)

    # tolerance loosened for bf16 weights/activations/output + approx-recip softmax
    TOL = dict(atol=2e-2, rtol=2e-2)

    # --- test 1: small batch, single grid step ---
    batch = 8
    x = jax.random.normal(k_x, (batch, obs_dim), jnp.float32)
    action_prob, state_values = policy_ind_forward(x, params)
    jax.block_until_ready((action_prob, state_values))

    ref_prob, ref_val = _reference(x, params)
    assert action_prob.shape == (batch, n_actions)
    assert state_values.shape == (batch, 1)
    assert jnp.allclose(action_prob, ref_prob, **TOL)
    assert jnp.allclose(state_values, ref_val, **TOL)

    # --- test 2: multi-step grid with a ragged last block (B % tile_b != 0) ---
    batch2 = 40
    x2 = jax.random.normal(k_x2, (batch2, obs_dim), jnp.float32)
    prob2, val2 = policy_ind_forward(x2, params, tile_b=16)   # grid = 3 steps (16,16,8)
    jax.block_until_ready((prob2, val2))

    ref_prob2, ref_val2 = _reference(x2, params)
    assert prob2.shape == (batch2, n_actions)
    assert val2.shape == (batch2, 1)
    assert jnp.allclose(prob2, ref_prob2, **TOL)
    assert jnp.allclose(val2, ref_val2, **TOL)

    print("KERNEL_OK")
</pallas_src>

<mosaic_0001>
module attributes {stable_mosaic.version = 11 : i64} {
  func.func @policy_ind_kernel(%arg0: i32, %arg1: memref<8x32xf32, #tpu.memory_space<vmem>>, %arg2: memref<32x256xbf16, #tpu.memory_space<vmem>>, %arg3: memref<1x256xf32, #tpu.memory_space<vmem>>, %arg4: memref<256x128xbf16, #tpu.memory_space<vmem>>, %arg5: memref<1x128xf32, #tpu.memory_space<vmem>>, %arg6: memref<8x128xbf16, #tpu.memory_space<vmem>>) attributes {dimension_semantics = [#tpu.dimension_semantics<parallel>], iteration_bounds = array<i64: 1>, scalar_prefetch = 0 : i64, scratch_operands = 0 : i64, tpu.core_type = #tpu.core_type<tc>, window_params = [{transform_indices = @transform_0, window_bounds = array<i64: 8, 32>}, {pipeline_mode = #tpu.pipeline_mode<synchronous>, transform_indices = @transform_1, window_bounds = array<i64: 32, 256>}, {pipeline_mode = #tpu.pipeline_mode<synchronous>, transform_indices = @transform_2, window_bounds = array<i64: 1, 256>}, {pipeline_mode = #tpu.pipeline_mode<synchronous>, transform_indices = @transform_3, window_bounds = array<i64: 256, 128>}, {pipeline_mode = #tpu.pipeline_mode<synchronous>, transform_indices = @transform_4, window_bounds = array<i64: 1, 128>}, {transform_indices = @transform_5, window_bounds = array<i64: 8, 128>}]} {
    %c0 = arith.constant 0 : index
    %c0_0 = arith.constant 0 : index
    %0 = vector.load %arg1[%c0, %c0_0] : memref<8x32xf32, #tpu.memory_space<vmem>>, vector<8x32xf32>
    %1 = arith.truncf %0 : vector<8x32xf32> to vector<8x32xbf16>
    %c0_1 = arith.constant 0 : index
    %c0_2 = arith.constant 0 : index
    %2 = vector.load %arg2[%c0_1, %c0_2] : memref<32x256xbf16, #tpu.memory_space<vmem>>, vector<32x256xbf16>
    %cst = arith.constant dense<0.000000e+00> : vector<8x256xf32>
    %3 = tpu.matmul %1, %2, %cst {dimension_numbers = #tpu.dot_dimension_numbers<[1], [0], [0], [1], [0, 0, 1, 1], [], []>} : vector<8x32xbf16>, vector<32x256xbf16>, vector<8x256xf32> -> vector<8x256xf32>
    %c0_3 = arith.constant 0 : index
    %c0_4 = arith.constant 0 : index
    %4 = vector.load %arg3[%c0_3, %c0_4] : memref<1x256xf32, #tpu.memory_space<vmem>>, vector<1x256xf32>
    %5 = vector.broadcast %4 : vector<1x256xf32> to vector<8x256xf32>
    %6 = arith.addf %3, %5 : vector<8x256xf32>
    %cst_5 = arith.constant 0.000000e+00 : f32
    %7 = vector.broadcast %cst_5 : f32 to vector<8x256xf32>
    %8 = arith.cmpf ogt, %6, %7 : vector<8x256xf32>
    %cst_6 = arith.constant 0.00999999977 : f32
    %9 = vector.broadcast %cst_6 : f32 to vector<8x256xf32>
    %10 = arith.mulf %9, %6 : vector<8x256xf32>
    %11 = arith.select %8, %6, %10 : vector<8x256xi1>, vector<8x256xf32>
    %12 = arith.truncf %11 : vector<8x256xf32> to vector<8x256xbf16>
    %c0_7 = arith.constant 0 : index
    %c0_8 = arith.constant 0 : index
    %13 = vector.load %arg4[%c0_7, %c0_8] : memref<256x128xbf16, #tpu.memory_space<vmem>>, vector<256x128xbf16>
    %cst_9 = arith.constant dense<0.000000e+00> : vector<8x128xf32>
    %14 = tpu.matmul %12, %13, %cst_9 {dimension_numbers = #tpu.dot_dimension_numbers<[1], [0], [0], [1], [0, 0, 1, 1], [], []>} : vector<8x256xbf16>, vector<256x128xbf16>, vector<8x128xf32> -> vector<8x128xf32>
    %c0_10 = arith.constant 0 : index
    %c0_11 = arith.constant 0 : index
    %15 = vector.load %arg5[%c0_10, %c0_11] : memref<1x128xf32, #tpu.memory_space<vmem>>, vector<1x128xf32>
    %16 = vector.broadcast %15 : vector<1x128xf32> to vector<8x128xf32>
    %17 = arith.addf %14, %16 : vector<8x128xf32>
    %18 = tpu.iota {dimensions = array<i32: 1>} : vector<8x128xi32>
    %c6_i32 = arith.constant 6 : i32
    %19 = vector.broadcast %c6_i32 : i32 to vector<8x128xi32>
    %20 = arith.cmpi slt, %18, %19 : vector<8x128xi32>
    %cst_12 = arith.constant 0xFF800000 : f32
    %21 = vector.broadcast %cst_12 : f32 to vector<8x128xf32>
    %22 = arith.select %20, %17, %21 : vector<8x128xi1>, vector<8x128xf32>
    %cst_13 = arith.constant dense<0xFF800000> : vector<8xf32>
    %23 = vector.multi_reduction <maximumf>, %22, %cst_13 [1] : vector<8x128xf32> to vector<8xf32>
    %24 = vector.shape_cast %23 : vector<8xf32> to vector<8x1xf32>
    %25 = vector.broadcast %24 : vector<8x1xf32> to vector<8x128xf32>
    %26 = arith.subf %22, %25 : vector<8x128xf32>
    %27 = math.exp %26 : vector<8x128xf32>
    %cst_14 = arith.constant dense<0.000000e+00> : vector<8xf32>
    %28 = vector.multi_reduction <add>, %27, %cst_14 [1] : vector<8x128xf32> to vector<8xf32>
    %29 = vector.shape_cast %28 : vector<8xf32> to vector<8x1xf32>
    %30 = tpu.reciprocal %29 {approx = true} : vector<8x1xf32> -> vector<8x1xf32>
    %31 = vector.broadcast %30 : vector<8x1xf32> to vector<8x128xf32>
    %32 = arith.mulf %27, %31 : vector<8x128xf32>
    %33 = arith.select %20, %32, %17 : vector<8x128xi1>, vector<8x128xf32>
    %34 = arith.truncf %33 : vector<8x128xf32> to vector<8x128xbf16>
    %c0_15 = arith.constant 0 : index
    %c0_16 = arith.constant 0 : index
    %35 = vector.load %arg6[%c0_15, %c0_16] : memref<8x128xbf16, #tpu.memory_space<vmem>>, vector<8x128xbf16>
    tpu.vector_store %arg6[%c0_15, %c0_16], %34 {strides = array<i32>} : memref<8x128xbf16, #tpu.memory_space<vmem>>, vector<8x128xbf16>,
    return
  }
  func.func @transform_0(%arg0: i32) -> (i32, i32) {
    %c0_i32 = arith.constant 0 : i32
    %c0_i32_0 = arith.constant 0 : i32
    return %arg0, %c0_i32 : i32, i32
  }
  func.func @transform_1(%arg0: i32) -> (i32, i32) {
    %c0_i32 = arith.constant 0 : i32
    %c0_i32_0 = arith.constant 0 : i32
    %c0_i32_1 = arith.constant 0 : i32
    return %c0_i32, %c0_i32_0 : i32, i32
  }
  func.func @transform_2(%arg0: i32) -> (i32, i32) {
    %c0_i32 = arith.constant 0 : i32
    %c0_i32_0 = arith.constant 0 : i32
    %c0_i32_1 = arith.constant 0 : i32
    return %c0_i32, %c0_i32_0 : i32, i32
  }
  func.func @transform_3(%arg0: i32) -> (i32, i32) {
    %c0_i32 = arith.constant 0 : i32
    %c0_i32_0 = arith.constant 0 : i32
    %c0_i32_1 = arith.constant 0 : i32
    return %c0_i32, %c0_i32_0 : i32, i32
  }
  func.func @transform_4(%arg0: i32) -> (i32, i32) {
    %c0_i32 = arith.constant 0 : i32
    %c0_i32_0 = arith.constant 0 : i32
    %c0_i32_1 = arith.constant 0 : i32
    return %c0_i32, %c0_i32_0 : i32, i32
  }
  func.func @transform_5(%arg0: i32) -> (i32, i32) {
    %c0_i32 = arith.constant 0 : i32
    %c0_i32_0 = arith.constant 0 : i32
    return %arg0, %c0_i32 : i32, i32
  }
}

</mosaic_0001>

<bundles_post_ra>
// kernel: tpu_custom_call.1
= control target key start
LH: loop header
LB: loop body
LE: loop exit
PB: predicated region body
PF: predicated region fallthrough
CT: control target
= control target key end

     0   :  { %10 = vsyncpa [#allocation3], 0  ;;  %s719_s0 = inlined_call_operand.hbm [shape: f32[8,32], index: 0, kind: input, shape index: {}]   ;;  %s720_s1 = inlined_call_operand.hbm [shape: bf16[32,256], index: 1, kind: input, shape index: {}]   ;;  %s721_s2 = inlined_call_operand.hbm [shape: f32[1,256], index: 2, kind: input, shape index: {}]   ;;  %s722_s3 = inlined_call_operand.hbm [shape: bf16[256,128], index: 3, kind: input, shape index: {}]   ;;  %s723_s4 = inlined_call_operand.hbm [shape: f32[1,128], index: 4, kind: input, shape index: {}]   ;;  %s724_s5 = inlined_call_operand.hbm [shape: bf16[8,128], index: 5, kind: output, shape index: {}]  }
   0x1   :  { %11 = vsyncpa [#allocation6], 0 }
   0x2   :  { %12 = vsyncpa [#allocation9], 0 }
   0x3   :  { %13 = vsyncpa [#allocation4], 0  ;;  %s604_s18 = smov [#allocation5]   ;;  %s464_s22 = scalar_lea.hbm %s720_s1, 512 }
   0x4   :  { %s29_s19 = sshll.u32 %s604_s18, 4  ;;  %p465_p0 = scmp.ne.s32.totalorder %s720_s1, %s464_s22  ;;  %s30_s19 = int_to_ptr.vmem [resolvable:$true] %s29_s19 }
   0x5   :  { %p468_p1 = scmp.lt.u32.totalorder %s464_s22, %s720_s1 }
   0x7   :  { %p470_p2 = pnand %p468_p1, %p465_p0 }
   0x9   :  { %473 = shalt.err (!%p470_p2)
}
   0xa   :  { %s474_s27 = scalar_lea.vmem %s30_s19, 512  ;;  %p479_p4 = scmp.lt.s32.totalorder %s30_s19, %s30_s19 }
   0xb   :  { %p475_p3 = scmp.ne.s32.totalorder %s30_s19, %s474_s27  ;;  %p480_p5 = scmp.lt.s32.totalorder %s474_s27, %s474_s27 }
   0xd   :  { %p481_p6 = por %p480_p5, %p479_p4 }
   0xf   :  { %p482_p7 = pnand %p481_p6, %p475_p3 }
  0x11   :  { %485 = shalt.err (!%p482_p7)
}
  0x12   :  { %s605_s28 = smov 128   ;;  %s606_s29 = smov 8  }
  0x13   :  { %35 = dma.hbm_to_vmem [thread:$0]  %s720_s1, 512, %s30_s19, [#allocation6], %s605_s28, %s605_s28, %s606_s29  }
  0x14   :  { %s607_s7 = smov [#allocation8]   ;;  %s486_s11 = scalar_lea.hbm %s722_s3, 2048 }
  0x15   :  { %s51_s8 = sshll.u32 %s607_s7, 4  ;;  %p487_p8 = scmp.ne.s32.totalorder %s722_s3, %s486_s11  ;;  %s52_s8 = int_to_ptr.vmem [resolvable:$true] %s51_s8 }
  0x16   :  { %p490_p9 = scmp.lt.u32.totalorder %s486_s11, %s722_s3 }
  0x18   :  { %p492_p10 = pnand %p490_p9, %p487_p8 }
  0x1a   :  { %495 = shalt.err (!%p492_p10)
}
  0x1b   :  { %s496_s16 = scalar_lea.vmem %s52_s8, 2048  ;;  %p501_p12 = scmp.lt.s32.totalorder %s52_s8, %s52_s8 }
  0x1c   :  { %p497_p11 = scmp.ne.s32.totalorder %s52_s8, %s496_s16  ;;  %p502_p13 = scmp.lt.s32.totalorder %s496_s16, %s496_s16 }
  0x1e   :  { %p503_p0 = por %p502_p13, %p501_p12 }
  0x20   :  { %p504_p1 = pnand %p503_p0, %p497_p11 }
  0x22   :  { %507 = shalt.err (!%p504_p1)
}
  0x23   :  { %s608_s1 = smov 64   ;;  %s609_s17 = smov 4  }
  0x24   :  { %57 = dma.hbm_to_vmem [thread:$0]  %s722_s3, 2048, %s52_s8, [#allocation9], %s608_s1, %s608_s1, %s609_s17  }
  0x25   :  { %s610_s20 = smov [#allocation2]   ;;  %s611_s22 = smov [#allocation7]  }
  0x26   :  { %s20_s21 = sshll.u32 %s610_s20, 4  ;;  %s42_s23 = sshll.u32 %s611_s22, 4  ;;  %s21_s21 = int_to_ptr.vmem [resolvable:$true] %s20_s21  ;;  %s43_s23 = int_to_ptr.vmem [resolvable:$true] %s42_s23 }
  0x27   :  { %s508_s26 = scalar_lea.hbm %s719_s0, 128 }
  0x28   :  { %p509_p2 = scmp.ne.s32.totalorder %s719_s0, %s508_s26  ;;  %p512_p3 = scmp.lt.u32.totalorder %s508_s26, %s719_s0 }
  0x2a   :  { %p514_p4 = pnand %p512_p3, %p509_p2 }
  0x2c   :  { %517 = shalt.err (!%p514_p4)
}
  0x2d   :  { %s518_s3 = scalar_lea.vmem %s21_s21, 128  ;;  %p523_p6 = scmp.lt.s32.totalorder %s21_s21, %s21_s21 }
  0x2e   :  { %p519_p5 = scmp.ne.s32.totalorder %s21_s21, %s518_s3  ;;  %p524_p7 = scmp.lt.s32.totalorder %s518_s3, %s518_s3 }
  0x30   :  { %p525_p8 = por %p524_p7, %p523_p6 }
  0x32   :  { %p526_p9 = pnand %p525_p8, %p519_p5 }
  0x34   :  { %529 = shalt.err (!%p526_p9)
}
  0x35   :  { %23 = dma.hbm_to_vmem [thread:$0]  %s719_s0, 128, %s21_s21, [#allocation3]  }
  0x36   :  { %s530_s10 = scalar_lea.hbm %s721_s2, 32 }
  0x37   :  { %p531_p10 = scmp.ne.s32.totalorder %s721_s2, %s530_s10  ;;  %p534_p11 = scmp.lt.u32.totalorder %s530_s10, %s721_s2 }
  0x39   :  { %p536_p12 = pnand %p534_p11, %p531_p10 }
  0x3b   :  { %539 = shalt.err (!%p536_p12)
}
  0x3c   :  { %s540_s15 = scalar_lea.vmem %s43_s23, 32  ;;  %p545_p0 = scmp.lt.s32.totalorder %s43_s23, %s43_s23 }
  0x3d   :  { %p541_p13 = scmp.ne.s32.totalorder %s43_s23, %s540_s15  ;;  %p546_p1 = scmp.lt.s32.totalorder %s540_s15, %s540_s15 }
  0x3f   :  { %p547_p2 = por %p546_p1, %p545_p0 }
  0x41   :  { %p548_p3 = pnand %p547_p2, %p541_p13 }
  0x43   :  { %551 = shalt.err (!%p548_p3)
}
  0x44   :  { %45 = dma.hbm_to_vmem [thread:$0]  %s721_s2, 32, %s43_s23, [#allocation6]  }
  0x45   :  { %s612_s1 = smov [#allocation10]   ;;  %s552_s20 = scalar_lea.hbm %s723_s4, 16 }
  0x46   :  { %s64_s17 = sshll.u32 %s612_s1, 4  ;;  %p553_p4 = scmp.ne.s32.totalorder %s723_s4, %s552_s20  ;;  %s65_s17 = int_to_ptr.vmem [resolvable:$true] %s64_s17 }
  0x47   :  { %p556_p5 = scmp.lt.u32.totalorder %s552_s20, %s723_s4 }
  0x49   :  { %p558_p6 = pnand %p556_p5, %p553_p4 }
  0x4b   :  { %561 = shalt.err (!%p558_p6)
}
  0x4c   :  { %s562_s26 = scalar_lea.vmem %s65_s17, 16  ;;  %s566_s2 = scalar_lea.vmem %s65_s17, 32 }
  0x4d   :  { %p563_p7 = scmp.ne.s32.totalorder %s65_s17, %s562_s26  ;;  %p567_p8 = scmp.lt.s32.totalorder %s65_s17, %s65_s17 }
  0x4e   :  { %p568_p9 = scmp.lt.s32.totalorder %s566_s2, %s562_s26 }
  0x50   :  { %p569_p10 = por %p568_p9, %p567_p8 }
  0x52   :  { %p570_p11 = pnand %p569_p10, %p563_p7 }
  0x54   :  { %573 = shalt.err (!%p570_p11)
}
  0x55   :  { %67 = dma.hbm_to_vmem [thread:$0]  %s723_s4, 16, %s65_s17, [#allocation9]  }
  0x56   :  { %596 = dma.done.wait [#allocation3], 128  }
  0x57   :  { %597 = vsyncadd [#allocation3], 4294967168 }
  0x58   :  { %598 = dma.done.wait [#allocation6], 544  }
  0x59   :  { %599 = vsyncadd [#allocation6], 4294966752 }
  0x5a   :  { %600 = dma.done.wait [#allocation9], 2064  }
  0x5b   :  { %601 = vsyncadd [#allocation9], 4294965232  ;;  %v613_v0 = vmov 0   ;;  %v438_v1 = vld [vmem:[#allocation5 + $0x4] ss:$8 sps:$4 sm:$0xff]   ;;  %v84_v5 = vld [vmem:[#allocation2] sm:$0xff]  ;;  %v92_v23 = vlaneseq }
  0x5c   :  { %158 = vmatprep.mubr.bf16.mxu0 %v613_v0  ;;  %v440_v2 = vld [vmem:[#allocation5] ss:$8 sps:$4 sm:$0xff]   ;;  %126 = vmatprep.subr.bf16.mxu0 %v438_v1  ;;  %v441_v3 = vld [vmem:[#allocation5 + $0x14] ss:$8 sps:$4 sm:$0xff]   ;;  %v443_v4 = vld [vmem:[#allocation5 + $0x10] ss:$8 sps:$4 sm:$0xff]   ;;  %v85_v9 = vpack.c.bf16 %v84_v5, %v84_v5 }
  0x5d   :  { %127 = vmatpush1.bf16.msra.mxu0 %v440_v2  ;;  %v444_v6 = vld [vmem:[#allocation8 + $0x40] sm:$0xff]   ;;  %v446_v8 = vld [vmem:[#allocation8 + $0x48] sm:$0xff]   ;;  %vm122_vm0 = vcmask 261120   ;;  %v448_v11 = vld [vmem:[#allocation8 + $0x50] sm:$0xff]   ;;  %v93_v24 = vshrl.u32 %v92_v23, 7  ;;  %v351_v42 = vand.u32 127, %v92_v23 }
  0x5e   :  { %128 = vmatprep.subr.bf16.mxu0 %v441_v3  ;;  %v445_v7 = vld [vmem:[#allocation8] sm:$0xff]   ;;  %405 = vmatprep.subr.bf16.mxu1 %v444_v6  ;;  %v447_v10 = vld [vmem:[#allocation8 + $0x8] sm:$0xff]   ;;  %v449_v12 = vld [vmem:[#allocation8 + $0x10] sm:$0xff]   ;;  %s614_s4 = smov [#allocation11]  }
  0x5f   :  { %406 = vmatpush3.bf16.msra.mxu1 %v445_v7  ;;  %v450_v13 = vld [vmem:[#allocation8 + $0x58] sm:$0xff]   ;;  %v452_v15 = vld [vmem:[#allocation8 + $0x60] sm:$0xff]   ;;  %v454_v17 = vld [vmem:[#allocation8 + $0x68] sm:$0xff]   ;;  %v94_v25 = vsub.s32 0, %v93_v24  ;;  %v98_v27 = vsub.s32 1, %v93_v24  ;;  %vm352_vm3 = vcmp.lt.s32.totalorder %v351_v42, 6 }
  0x60   :  { %407 = vmatprep.subr.bf16.mxu1 %v446_v8  ;;  %v451_v14 = vld [vmem:[#allocation8 + $0x18] sm:$0xff]   ;;  %v453_v16 = vld [vmem:[#allocation8 + $0x20] sm:$0xff]   ;;  %v455_v18 = vld [vmem:[#allocation8 + $0x28] sm:$0xff]   ;;  %s372_s28 = sshll.u32 %s614_s4, 4  ;;  %s373_s28 = int_to_ptr.vmem [resolvable:$true] %s372_s28 }
  0x61   :  { %129 = vmatpush1.bf16.msra.mxu0 %v443_v4  ;;  %v456_v19 = vld [vmem:[#allocation8 + $0x70] sm:$0xff]   ;;  %v458_v21 = vld [vmem:[#allocation8 + $0x78] sm:$0xff]   ;;  %v388_v45 = vld [vmem:[#allocation10] ss:$0 sm:$0xff]  ;;  %s574_s29 = scalar_lea.vmem %s373_s28, 64  ;;  %p579_p13 = scmp.lt.s32.totalorder %s373_s28, %s373_s28 }
  0x62   :  { %v457_v20 = vld [vmem:[#allocation8 + $0x30] sm:$0xff]   ;;  %v459_v22 = vld [vmem:[#allocation8 + $0x38] sm:$0xff]   ;;  %p575_p12 = scmp.ne.s32.totalorder %s373_s28, %s574_s29  ;;  %p580_p0 = scmp.lt.s32.totalorder %s574_s29, %s574_s29 }
  0x63   :  { %408 = vmatpush3.bf16.msra.mxu1 %v447_v10  ;;  %v90_v26 = vld [vmem:[#allocation7] sm:$0x3] }
  0x64   :  { %387 = vmatmul.mubr.msk.bf16.vlgmr.msra.gmra.mrb[0].mxu0 %vm122_vm0, %v85_v9  ;;  %409 = vmatprep.subr.bf16.mxu1 %v448_v11  ;;  %v95_v28 = vrot.slane %v90_v26, %v94_v25  ;;  %v99_v29 = vrot.slane %v90_v26, %v98_v27  ;;  %p581_p1 = por %p580_p0, %p579_p13 }
  0x66   :  { %p582_p2 = pnand %p581_p1, %p575_p12 }
  0x67   :  { %410 = vmatpush3.bf16.msra.mxu1 %v449_v12 }
  0x68   :  { %411 = vmatprep.subr.bf16.mxu1 %v450_v13 }
  0x6b   :  { %412 = vmatpush3.bf16.msra.mxu1 %v451_v14 }
  0x6c   :  { %413 = vmatprep.subr.bf16.mxu1 %v452_v15 }
  0x6f   :  { %414 = vmatpush3.bf16.msra.mxu1 %v453_v16 }
  0x70   :  { %415 = vmatprep.subr.bf16.mxu1 %v454_v17 }
  0x73   :  { %416 = vmatpush3.bf16.msra.mxu1 %v455_v18 }
  0x74   :  { %417 = vmatprep.subr.bf16.mxu1 %v456_v19 }
  0x77   :  { %418 = vmatpush3.bf16.msra.mxu1 %v457_v20 }
  0x78   :  { %419 = vmatprep.subr.bf16.mxu1 %v458_v21 }
  0x7b   :  { %420 = vmatpush3.bf16.msra.mxu1 %v459_v22 }
 0x137   :  { %v160_v30 = vpop.f32.mrb[0].mxu0 }
 0x138   :  { %v161_v31 = vadd.f32 %v160_v30, %v95_v28  ;;  %v162_v32 = vpop.f32.mrb[1].mxu0 }
 0x139   :  { %v163_v33 = vadd.f32 %v162_v32, %v99_v29  ;;  %v164_v34 = vpop.f32.mrb[2].mxu0 }
 0x13a   :  { %vm167_vm1 = vcmp.gt.f32.partialorder %v161_v31, 0.0  ;;  %v169_v35 = vmul.f32 0.01, %v161_v31  ;;  %v165_v36 = vpop.f32.mrb[3].mxu0 }
 0x13b   :  { %vm168_vm2 = vcmp.gt.f32.partialorder %v163_v33, 0.0  ;;  %v170_v37 = vmul.f32 0.01, %v163_v33 }
 0x13c   :  { %v171_v38 = vsel %vm167_vm1, %v161_v31, %v169_v35 }
 0x13d   :  { %v172_v39 = vsel %vm168_vm2, %v163_v33, %v170_v37  ;;  %v173_v41 = vpack.c.bf16 %v171_v38, %v171_v38 }
 0x13e   :  { %v174_v40 = vpack.c.bf16 %v172_v39, %v172_v39 }
 0x140   :  { %342 = vmatprep.mubr.bf16.mxu1 %v174_v40 }
 0x141   :  { %343 = vmatmul.mubr.bf16.vlgmr.msra.gmra.mrb[0].mxu1 %v173_v41 }
 0x214   :  { %v421_v43 = vpop.f32.mrb[0].mxu1 }
 0x215   :  { %v422_v44 = vpop.f32.mrb[1].mxu1 }
 0x216   :  { %v423_v46 = vadd.f32 %v422_v44, %v421_v43  ;;  %v424_v47 = vpop.f32.mrb[2].mxu1 }
 0x217   :  { %v425_v48 = vpop.f32.mrb[3].mxu1 }
 0x218   :  { %v345_v49 = vadd.f32 %v423_v46, %v388_v45 }
 0x21a   :  { %v353_v50 = vsel %vm352_vm3, %v345_v49, -inf }
 0x21b   :  { %354 = vmax.xlane.f32.xlu0 %v353_v50 }
 0x2a8   :  { %v355_v51 = vpop.xlane.xlu0 %354 }
 0x2a9   :  { %v356_v52 = vsub.f32 %v353_v50, %v355_v51 }
 0x2ab   :  { %v357_v53 = vmul.f32 1.442695, %v356_v52 }
 0x2ad   :  { %460 = vpow2.f32 %v357_v53 }
 0x2b7   :  { %v461_v54 = vpop.eup %460 }
 0x2b8   :  { %359 = vadd.xlane.f32.xlu0 %v461_v54 }
 0x345   :  { %v360_v55 = vpop.xlane.xlu0 %359 }
 0x346   :  { %462 = vrcp.f32 %v360_v55 }
 0x350   :  { %v463_v56 = vpop.eup %462 }
 0x351   :  { %v362_v57 = vmul.f32 %v463_v56, %v461_v54 }
 0x353   :  { %v363_v58 = vsel %vm352_vm3, %v362_v57, %v345_v49 }
 0x354   :  { %v364_v59 = vpack.c.bf16 %v363_v58, %v363_v58 }
 0x356   :  { %365 = vst [vmem:[#allocation11] sm:$0xf] %v364_v59 }
 0x357   :  { %585 = shalt.err (!%p582_p2)
}
 0x358   :  { %s586_s6 = scalar_lea.hbm %s724_s5, 64 }
 0x359   :  { %p587_p3 = scmp.ne.s32.totalorder %s724_s5, %s586_s6  ;;  %p590_p4 = scmp.lt.u32.totalorder %s586_s6, %s724_s5 }
 0x35b   :  { %p592_p5 = pnand %p590_p4, %p587_p3 }
 0x35d   :  { %595 = shalt.err (!%p592_p5)
}
 0x35e   :  { %375 = dma.vmem_to_hbm [thread:$0]  %s373_s28, 64, %s724_s5, [#allocation4]  }
 0x35f   :  { %602 = dma.done.wait [#allocation4], 64  }
 0x360   :  { %603 = vsyncadd [#allocation4], 4294967232 }
 0x361   :  { %379 = vsyncpa [#allocation3], 1 }
 0x362   :  { %380 = vsyncpa [#allocation6], 1 }
 0x363   :  { %381 = vsyncpa [#allocation9], 1 }
 0x364   :  { %382 = vsyncpa [#allocation4], 1 }

</bundles_post_ra>
